<compile_context>
chip_gen: v5e
topology: v5e:2x2
jax: 0.10.0
libtpu: 0.0.40
codegen_flags: <defaults>
</compile_context>

<pallas_src>
import jax
import jax.numpy as jnp
from jax.experimental import pallas as pl
from jax.experimental.pallas import tpu as pltpu

LANE = 128


def _round_up(v, m):
    return ((v + m - 1) // m) * m


def _vmem_capacity_bytes():
    """Per-core VMEM capacity; conservative (v7x) fallback if the query fails."""
    try:
        info = pltpu.get_tpu_info()
        cap = getattr(info, "vmem_capacity_bytes", None)
        if cap:
            return int(cap)
    except Exception:
        pass
    return 64 * 1024 * 1024


def _linear_kernel(x_ref, w_ref, b_ref, o_ref):
    # x_ref: (tm, K) bf16 | w_ref: (K, n_pad) bf16 | b_ref: (1, n_pad) f32
    # o_ref: (tm, n_pad) f32
    acc = jnp.dot(x_ref[...], w_ref[...], preferred_element_type=jnp.float32)
    o_ref[...] = (acc + b_ref[...]).astype(o_ref.dtype)


def prepare_params(weight, bias, compute_dtype=jnp.bfloat16):
    """One-time parameter prep (do at load time and cache).

    * Pre-transpose to [in_dim, n_pad]  (canonical MXU [K, N] layout).
    * Zero-pad the class dim to a multiple of 128 (lane-dense output block).
    * Cast the weight to the bf16 compute dtype (half the HBM bytes, bf16 MXU).
    * Bias stays float32 and is added after the f32 accumulation.
    """
    n_class, in_dim = weight.shape
    n_pad = _round_up(max(n_class, 1), LANE)
    w_kn = jnp.zeros((in_dim, n_pad), compute_dtype)
    w_kn = w_kn.at[:, :n_class].set(weight.T.astype(compute_dtype))
    b_pad = jnp.zeros((1, n_pad), jnp.float32)
    b_pad = b_pad.at[0, :n_class].set(bias.astype(jnp.float32))
    return w_kn, b_pad


def _choose_tile_and_vmem(batch, in_dim, n_pad, x_itemsize, w_bytes, b_bytes,
                          block_rows):
    """Largest batch tile that keeps 2-deep pipelining inside the VMEM budget,
    while guaranteeing >= 2 grid steps when batch > 8 (v7x megacore)."""
    cap = _vmem_capacity_bytes()
    budget = int(cap * 0.7)                      # headroom for compiler scratch
    out_itemsize = 4                             # f32 output
    fixed = 2 * w_bytes + 2 * b_bytes            # worst case: residents 2x-buffered
    per_row = 2 * in_dim * x_itemsize + 2 * n_pad * out_itemsize
    tm_cap = max(8, (budget - fixed) // per_row)

    if batch <= 8:
        tm = batch                               # full-extent block (legal)
    else:
        tm = min(int(block_rows), int(tm_cap))
        # keep >= 2 grid steps so the parallel batch axis can feed both v7x TCs
        tm = min(tm, _round_up(pl.cdiv(batch, 2), 8))
        tm = max(8, (tm // 8) * 8)

    needed = tm * per_row + fixed
    vmem_limit = int(min(max(needed + (4 << 20), 32 << 20), cap))
    return tm, vmem_limit


def _pallas_linear(x, w_kn, b_pad, tm, n_pad, grid, vmem_limit, single_buffer):
    batch, in_dim = x.shape
    resident_kwargs = {"pipeline_mode": pl.Buffered(1)} if single_buffer else {}
    return pl.pallas_call(
        _linear_kernel,
        out_shape=jax.ShapeDtypeStruct((batch, n_pad), jnp.float32),
        grid=grid,
        in_specs=[
            pl.BlockSpec((tm, in_dim), lambda i: (i, 0)),               # x: batch-tiled
            pl.BlockSpec((in_dim, n_pad), lambda i: (0, 0),
                         **resident_kwargs),                            # weight: resident
            pl.BlockSpec((1, n_pad), lambda i: (0, 0),
                         **resident_kwargs),                            # bias: resident
        ],
        out_specs=pl.BlockSpec((tm, n_pad), lambda i: (i, 0)),
        compiler_params=pltpu.CompilerParams(
            dimension_semantics=("parallel",),
            vmem_limit_bytes=vmem_limit,
        ),
    )(x, w_kn, b_pad)


def logistic_regression_forward(x, w_kn, b_pad, n_class, *, block_rows=1024):
    """Forward pass of nn.Linear(in_dim, n_class).

    Args:
      x:      [batch, in_dim] (f32 or bf16; cast to the weight's compute dtype)
      w_kn:   [in_dim, n_pad] compute-dtype weight from prepare_params
      b_pad:  [1, n_pad] f32 bias from prepare_params
      n_class: true number of classes (padded lanes sliced off)
    Returns:
      [batch, n_class] float32 logits.
    """
    batch, in_dim = x.shape
    k, n_pad = w_kn.shape
    assert k == in_dim and n_class <= n_pad

    compute_dtype = w_kn.dtype
    if x.dtype != compute_dtype:
        # In a real model the upstream op emits bf16 directly; under jit this
        # cast fuses into the producer of x.
        x = x.astype(compute_dtype)

    x_itemsize = jnp.dtype(compute_dtype).itemsize
    w_bytes = w_kn.size * jnp.dtype(w_kn.dtype).itemsize
    b_bytes = b_pad.size * 4
    tm, vmem_limit = _choose_tile_and_vmem(
        batch, in_dim, n_pad, x_itemsize, w_bytes, b_bytes, block_rows)
    grid = (pl.cdiv(batch, tm),)

    try:
        out_padded = _pallas_linear(x, w_kn, b_pad, tm, n_pad, grid,
                                    vmem_limit, single_buffer=True)
    except Exception:
        # pipeline_mode=pl.Buffered(1) not supported by this JAX build.
        out_padded = _pallas_linear(x, w_kn, b_pad, tm, n_pad, grid,
                                    vmem_limit, single_buffer=False)

    # NOTE: a fused downstream softmax/argmax could consume the padded logits
    # (with padded bias lanes set to -inf) and skip this slice copy entirely.
    return out_padded[:, :n_class]


if __name__ == "__main__":
    # Small shapes consistent with the module's forward: x is [batch, in_dim].
    batch, in_dim, n_class = 8, 32, 10

    key = jax.random.PRNGKey(0)
    kx, kw, kb = jax.random.split(key, 3)

    x = jax.random.normal(kx, (batch, in_dim), dtype=jnp.float32)

    # Deterministic parameter init (mimic PyTorch nn.Linear uniform(-1/sqrt(in), 1/sqrt(in))).
    bound = 1.0 / (in_dim ** 0.5)
    weight = jax.random.uniform(kw, (n_class, in_dim), dtype=jnp.float32,
                                minval=-bound, maxval=bound)
    bias = jax.random.uniform(kb, (n_class,), dtype=jnp.float32,
                              minval=-bound, maxval=bound)

    # One-time parameter prep (cached in a real model).
    w_kn, b_pad = prepare_params(weight, bias, compute_dtype=jnp.bfloat16)

    out = logistic_regression_forward(x, w_kn, b_pad, n_class)
    out = jax.block_until_ready(out)

    ref = x @ weight.T + bias
    assert out.shape == (batch, n_class)
    # bf16 inputs / f32 accumulation: relaxed tolerance vs. the f32 reference.
    assert jnp.allclose(out, ref, atol=5e-2, rtol=5e-2), "mismatch vs reference"

    # Second check: multi-step grid with a ragged last batch tile.
    batch2 = 20
    x2 = jax.random.normal(jax.random.PRNGKey(1), (batch2, in_dim), dtype=jnp.float32)
    out2 = jax.block_until_ready(
        logistic_regression_forward(x2, w_kn, b_pad, n_class, block_rows=8))
    ref2 = x2 @ weight.T + bias
    assert out2.shape == (batch2, n_class)
    assert jnp.allclose(out2, ref2, atol=5e-2, rtol=5e-2), "mismatch (ragged grid)"

    print("KERNEL_OK")
</pallas_src>

<mosaic_0001>
module attributes {stable_mosaic.version = 11 : i64} {
  func.func @_linear_kernel(%arg0: i32, %arg1: memref<8x32xbf16, #tpu.memory_space<vmem>>, %arg2: memref<32x128xbf16, #tpu.memory_space<vmem>>, %arg3: memref<1x128xf32, #tpu.memory_space<vmem>>, %arg4: memref<8x128xf32, #tpu.memory_space<vmem>>) attributes {dimension_semantics = [#tpu.dimension_semantics<parallel>], iteration_bounds = array<i64: 1>, scalar_prefetch = 0 : i64, scratch_operands = 0 : i64, tpu.core_type = #tpu.core_type<tc>, window_params = [{transform_indices = @transform_0, window_bounds = array<i64: 8, 32>}, {pipeline_mode = #tpu.pipeline_mode<synchronous>, transform_indices = @transform_1, window_bounds = array<i64: 32, 128>}, {pipeline_mode = #tpu.pipeline_mode<synchronous>, transform_indices = @transform_2, window_bounds = array<i64: 1, 128>}, {transform_indices = @transform_3, window_bounds = array<i64: 8, 128>}]} {
    %c0 = arith.constant 0 : index
    %c0_0 = arith.constant 0 : index
    %0 = vector.load %arg1[%c0, %c0_0] : memref<8x32xbf16, #tpu.memory_space<vmem>>, vector<8x32xbf16>
    %c0_1 = arith.constant 0 : index
    %c0_2 = arith.constant 0 : index
    %1 = vector.load %arg2[%c0_1, %c0_2] : memref<32x128xbf16, #tpu.memory_space<vmem>>, vector<32x128xbf16>
    %cst = arith.constant dense<0.000000e+00> : vector<8x128xf32>
    %2 = tpu.matmul %0, %1, %cst {dimension_numbers = #tpu.dot_dimension_numbers<[1], [0], [0], [1], [0, 0, 1, 1], [], []>} : vector<8x32xbf16>, vector<32x128xbf16>, vector<8x128xf32> -> vector<8x128xf32>
    %c0_3 = arith.constant 0 : index
    %c0_4 = arith.constant 0 : index
    %3 = vector.load %arg3[%c0_3, %c0_4] : memref<1x128xf32, #tpu.memory_space<vmem>>, vector<1x128xf32>
    %4 = vector.broadcast %3 : vector<1x128xf32> to vector<8x128xf32>
    %5 = arith.addf %2, %4 : vector<8x128xf32>
    %c0_5 = arith.constant 0 : index
    %c0_6 = arith.constant 0 : index
    %6 = vector.load %arg4[%c0_5, %c0_6] : memref<8x128xf32, #tpu.memory_space<vmem>>, vector<8x128xf32>
    tpu.vector_store %arg4[%c0_5, %c0_6], %5 {strides = array<i32>} : memref<8x128xf32, #tpu.memory_space<vmem>>, vector<8x128xf32>,
    return
  }
  func.func @transform_0(%arg0: i32) -> (i32, i32) {
    %c0_i32 = arith.constant 0 : i32
    %c0_i32_0 = arith.constant 0 : i32
    return %arg0, %c0_i32 : i32, i32
  }
  func.func @transform_1(%arg0: i32) -> (i32, i32) {
    %c0_i32 = arith.constant 0 : i32
    %c0_i32_0 = arith.constant 0 : i32
    %c0_i32_1 = arith.constant 0 : i32
    return %c0_i32, %c0_i32_0 : i32, i32
  }
  func.func @transform_2(%arg0: i32) -> (i32, i32) {
    %c0_i32 = arith.constant 0 : i32
    %c0_i32_0 = arith.constant 0 : i32
    %c0_i32_1 = arith.constant 0 : i32
    return %c0_i32, %c0_i32_0 : i32, i32
  }
  func.func @transform_3(%arg0: i32) -> (i32, i32) {
    %c0_i32 = arith.constant 0 : i32
    %c0_i32_0 = arith.constant 0 : i32
    return %arg0, %c0_i32 : i32, i32
  }
}

module attributes {stable_mosaic.version = 11 : i64} {
  func.func @_linear_kernel(%arg0: i32, %arg1: memref<8x32xbf16, #tpu.memory_space<vmem>>, %arg2: memref<32x128xbf16, #tpu.memory_space<vmem>>, %arg3: memref<1x128xf32, #tpu.memory_space<vmem>>, %arg4: memref<8x128xf32, #tpu.memory_space<vmem>>) attributes {dimension_semantics = [#tpu.dimension_semantics<parallel>], iteration_bounds = array<i64: 1>, scalar_prefetch = 0 : i64, scratch_operands = 0 : i64, tpu.core_type = #tpu.core_type<tc>, window_params = [{transform_indices = @transform_0, window_bounds = array<i64: 8, 32>}, {pipeline_mode = #tpu.pipeline_mode<synchronous>, transform_indices = @transform_1, window_bounds = array<i64: 32, 128>}, {pipeline_mode = #tpu.pipeline_mode<synchronous>, transform_indices = @transform_2, window_bounds = array<i64: 1, 128>}, {transform_indices = @transform_3, window_bounds = array<i64: 8, 128>}]} {
    %c0 = arith.constant 0 : index
    %c0_0 = arith.constant 0 : index
    %0 = vector.load %arg1[%c0, %c0_0] : memref<8x32xbf16, #tpu.memory_space<vmem>>, vector<8x32xbf16>
    %c0_1 = arith.constant 0 : index
    %c0_2 = arith.constant 0 : index
    %1 = vector.load %arg2[%c0_1, %c0_2] : memref<32x128xbf16, #tpu.memory_space<vmem>>, vector<32x128xbf16>
    %cst = arith.constant dense<0.000000e+00> : vector<8x128xf32>
    %2 = tpu.matmul %0, %1, %cst {dimension_numbers = #tpu.dot_dimension_numbers<[1], [0], [0], [1], [0, 0, 1, 1], [], []>} : vector<8x32xbf16>, vector<32x128xbf16>, vector<8x128xf32> -> vector<8x128xf32>
    %c0_3 = arith.constant 0 : index
    %c0_4 = arith.constant 0 : index
    %3 = vector.load %arg3[%c0_3, %c0_4] : memref<1x128xf32, #tpu.memory_space<vmem>>, vector<1x128xf32>
    %4 = vector.broadcast %3 : vector<1x128xf32> to vector<8x128xf32>
    %5 = arith.addf %2, %4 : vector<8x128xf32>
    %c0_5 = arith.constant 0 : index
    %c0_6 = arith.constant 0 : index
    %6 = vector.load %arg4[%c0_5, %c0_6] : memref<8x128xf32, #tpu.memory_space<vmem>>, vector<8x128xf32>
    tpu.vector_store %arg4[%c0_5, %c0_6], %5 {strides = array<i32>} : memref<8x128xf32, #tpu.memory_space<vmem>>, vector<8x128xf32>,
    return
  }
  func.func @transform_0(%arg0: i32) -> (i32, i32) {
    %c0_i32 = arith.constant 0 : i32
    %c0_i32_0 = arith.constant 0 : i32
    return %arg0, %c0_i32 : i32, i32
  }
  func.func @transform_1(%arg0: i32) -> (i32, i32) {
    %c0_i32 = arith.constant 0 : i32
    %c0_i32_0 = arith.constant 0 : i32
    %c0_i32_1 = arith.constant 0 : i32
    return %c0_i32, %c0_i32_0 : i32, i32
  }
  func.func @transform_2(%arg0: i32) -> (i32, i32) {
    %c0_i32 = arith.constant 0 : i32
    %c0_i32_0 = arith.constant 0 : i32
    %c0_i32_1 = arith.constant 0 : i32
    return %c0_i32, %c0_i32_0 : i32, i32
  }
  func.func @transform_3(%arg0: i32) -> (i32, i32) {
    %c0_i32 = arith.constant 0 : i32
    %c0_i32_0 = arith.constant 0 : i32
    return %arg0, %c0_i32 : i32, i32
  }
}

</mosaic_0001>

<bundles_post_ra>
// kernel: tpu_custom_call.1
= control target key start
LH: loop header
LB: loop body
LE: loop exit
PB: predicated region body
PF: predicated region fallthrough
CT: control target
= control target key end

     0   :  { %8 = vsyncpa [#allocation3], 0  ;;  %s235_s0 = inlined_call_operand.hbm [shape: bf16[8,32], index: 0, kind: input, shape index: {}]   ;;  %s236_s1 = inlined_call_operand.hbm [shape: bf16[32,128], index: 1, kind: input, shape index: {}]   ;;  %s237_s2 = inlined_call_operand.vmem [shape: f32[1,128], index: 2, kind: input, shape index: {}]   ;;  %s238_s3 = inlined_call_operand.hbm [shape: f32[8,128], index: 3, kind: output, shape index: {}]  }
   0x1   :  { %9 = vsyncpa [#allocation6], 0 }
   0x2   :  { %10 = vsyncpa [#allocation4], 0  ;;  %s16_s14 = sshll.u32 %s235_s0, 4  ;;  %s198_s15 = smov [#allocation2]   ;;  %s17_s14 = int_to_ptr.hbm [resolvable:$true] %s16_s14 }
   0x3   :  { %s18_s16 = sshll.u32 %s198_s15, 4  ;;  %s26_s19 = sshll.u32 %s236_s1, 4  ;;  %s19_s16 = int_to_ptr.vmem [resolvable:$true] %s18_s16  ;;  %s27_s19 = int_to_ptr.hbm [resolvable:$true] %s26_s19 }
   0x4   :  { %21 = dma.hbm_to_vmem [thread:$0]  %s17_s14, 64, %s19_s16, [#allocation3]  }
   0x5   :  { %s199_s20 = smov [#allocation5]   ;;  %s200_s22 = smov 64  }
   0x6   :  { %s28_s21 = sshll.u32 %s199_s20, 4  ;;  %s201_s23 = smov 4   ;;  %s29_s21 = int_to_ptr.vmem [resolvable:$true] %s28_s21 }
   0x7   :  { %34 = dma.hbm_to_vmem [thread:$0]  %s27_s19, 256, %s29_s21, [#allocation6], %s200_s22, %s200_s22, %s201_s23  }
   0x8   :  { %192 = dma.done.wait [#allocation3], 64  }
   0x9   :  { %193 = vsyncadd [#allocation3], 4294967232 }
   0xa   :  { %194 = dma.done.wait [#allocation6], 256  }
   0xb   :  { %195 = vsyncadd [#allocation6], 4294967040  ;;  %v113_v0 = vld [vmem:[#allocation5 + $0x8] sm:$0xff]  ;;  %v112_v1 = vld [vmem:[#allocation5] sm:$0xff]  ;;  %vm67_vm0 = vcmask 261120   ;;  %s202_s24 = smov [#allocation7]  }
   0xc   :  { %77 = vmatpush.bf16.msra.mxu0 %v113_v0  ;;  %v46_v2 = vld [vmem:[#allocation2] sm:$0xf]  ;;  %s90_s25 = sshll.u32 %s202_s24, 4  ;;  %s92_s28 = sshll.u32 %s238_s3, 4  ;;  %s91_s25 = int_to_ptr.vmem [resolvable:$true] %s90_s25  ;;  %s93_s28 = int_to_ptr.hbm [resolvable:$true] %s92_s28 }
   0xd   :  { %v119_v3 = vld [vmem:[%s237_s2] ss:$0 sm:$0xff] }
  0x10   :  { %78 = vmatpush.bf16.msra.mxu0 %v112_v1 }
  0x13   :  { %111 = vmatmul.msk.bf16.vlgmr.msra.gmra.mxu0 %vm67_vm0, %v46_v2 }
  0x90   :  { %v80_v4 = vpop.f32.mrf.mxu0 }
  0x91   :  { %v81_v5 = vadd.f32 %v119_v3, %v80_v4 }
  0x93   :  { %84 = vst [vmem:[#allocation7] sm:$0xff] %v81_v5 }
  0x94   :  { %95 = dma.vmem_to_hbm [thread:$0]  %s91_s25, 128, %s93_s28, [#allocation4]  }
  0x98   :  { %v82_v6 = vpop.f32.mrf.mxu0 }
  0x99   :  { %196 = dma.done.wait [#allocation4], 128  }
  0x9a   :  { %197 = vsyncadd [#allocation4], 4294967168 }
  0x9b   :  { %100 = vsyncpa [#allocation3], 1 }
  0x9c   :  { %101 = vsyncpa [#allocation6], 1 }
  0x9d   :  { %102 = vsyncpa [#allocation4], 1 }

// kernel: tpu_custom_call.1
= control target key start
LH: loop header
LB: loop body
LE: loop exit
PB: predicated region body
PF: predicated region fallthrough
CT: control target
= control target key end

     0   :  { %8 = vsyncpa [#allocation3], 0  ;;  %s235_s0 = inlined_call_operand.hbm [shape: bf16[8,32], index: 0, kind: input, shape index: {}]   ;;  %s236_s1 = inlined_call_operand.hbm [shape: bf16[32,128], index: 1, kind: input, shape index: {}]   ;;  %s237_s2 = inlined_call_operand.vmem [shape: f32[1,128], index: 2, kind: input, shape index: {}]   ;;  %s238_s3 = inlined_call_operand.hbm [shape: f32[8,128], index: 3, kind: output, shape index: {}]  }
   0x1   :  { %9 = vsyncpa [#allocation6], 0 }
   0x2   :  { %10 = vsyncpa [#allocation4], 0  ;;  %s16_s14 = sshll.u32 %s235_s0, 4  ;;  %s198_s15 = smov [#allocation2]   ;;  %s17_s14 = int_to_ptr.hbm [resolvable:$true] %s16_s14 }
   0x3   :  { %s18_s16 = sshll.u32 %s198_s15, 4  ;;  %s26_s19 = sshll.u32 %s236_s1, 4  ;;  %s19_s16 = int_to_ptr.vmem [resolvable:$true] %s18_s16  ;;  %s27_s19 = int_to_ptr.hbm [resolvable:$true] %s26_s19 }
   0x4   :  { %21 = dma.hbm_to_vmem [thread:$0]  %s17_s14, 64, %s19_s16, [#allocation3]  }
   0x5   :  { %s199_s20 = smov [#allocation5]   ;;  %s200_s22 = smov 64  }
   0x6   :  { %s28_s21 = sshll.u32 %s199_s20, 4  ;;  %s201_s23 = smov 4   ;;  %s29_s21 = int_to_ptr.vmem [resolvable:$true] %s28_s21 }
   0x7   :  { %34 = dma.hbm_to_vmem [thread:$0]  %s27_s19, 256, %s29_s21, [#allocation6], %s200_s22, %s200_s22, %s201_s23  }
   0x8   :  { %192 = dma.done.wait [#allocation3], 64  }
   0x9   :  { %193 = vsyncadd [#allocation3], 4294967232 }
   0xa   :  { %194 = dma.done.wait [#allocation6], 256  }
   0xb   :  { %195 = vsyncadd [#allocation6], 4294967040  ;;  %v113_v0 = vld [vmem:[#allocation5 + $0x8] sm:$0xff]  ;;  %v112_v1 = vld [vmem:[#allocation5] sm:$0xff]  ;;  %vm67_vm0 = vcmask 261120   ;;  %s202_s24 = smov [#allocation7]  }
   0xc   :  { %77 = vmatpush.bf16.msra.mxu0 %v113_v0  ;;  %v46_v2 = vld [vmem:[#allocation2] sm:$0xf]  ;;  %s90_s25 = sshll.u32 %s202_s24, 4  ;;  %s92_s28 = sshll.u32 %s238_s3, 4  ;;  %s91_s25 = int_to_ptr.vmem [resolvable:$true] %s90_s25  ;;  %s93_s28 = int_to_ptr.hbm [resolvable:$true] %s92_s28 }
   0xd   :  { %v119_v3 = vld [vmem:[%s237_s2] ss:$0 sm:$0xff] }
  0x10   :  { %78 = vmatpush.bf16.msra.mxu0 %v112_v1 }
  0x13   :  { %111 = vmatmul.msk.bf16.vlgmr.msra.gmra.mxu0 %vm67_vm0, %v46_v2 }
  0x90   :  { %v80_v4 = vpop.f32.mrf.mxu0 }
  0x91   :  { %v81_v5 = vadd.f32 %v119_v3, %v80_v4 }
  0x93   :  { %84 = vst [vmem:[#allocation7] sm:$0xff] %v81_v5 }
  0x94   :  { %95 = dma.vmem_to_hbm [thread:$0]  %s91_s25, 128, %s93_s28, [#allocation4]  }
  0x98   :  { %v82_v6 = vpop.f32.mrf.mxu0 }
  0x99   :  { %196 = dma.done.wait [#allocation4], 128  }
  0x9a   :  { %197 = vsyncadd [#allocation4], 4294967168 }
  0x9b   :  { %100 = vsyncpa [#allocation3], 1 }
  0x9c   :  { %101 = vsyncpa [#allocation6], 1 }
  0x9d   :  { %102 = vsyncpa [#allocation4], 1 }

</bundles_post_ra>
